<compile_context>
chip_gen: v7x
topology: tpu7x:2x2x1
jax: 0.10.0
libtpu: 0.0.40
codegen_flags: <defaults>
</compile_context>

<pallas_src>
import jax
import jax.numpy as jnp
from jax.experimental import pallas as pl
from jax.experimental.pallas import tpu as pltpu

LANE = 128
SUBLANE = 8


def _round_up(x, m):
    return (x + m - 1) // m * m


def dqn_kernel(x_ref, w1_ref, b1_ref, w2_ref, b2_ref,
               w3_ref, b3_ref, w4_ref, b4_ref, o_ref):
    # Matmul inputs in bf16 (MXU-native on v6e/v7x), accumulate in f32.
    # Bias-add / ReLU stay f32 (v5e-friendly; VALU has slack here anyway).
    x = x_ref[...].astype(jnp.bfloat16)

    h1 = jnp.dot(x, w1_ref[...], preferred_element_type=jnp.float32)
    h1 = jnp.maximum(h1 + b1_ref[...], 0.0)

    h2 = jnp.dot(h1.astype(jnp.bfloat16), w2_ref[...],
                 preferred_element_type=jnp.float32)
    h2 = jnp.maximum(h2 + b2_ref[...], 0.0)

    h3 = jnp.dot(h2.astype(jnp.bfloat16), w3_ref[...],
                 preferred_element_type=jnp.float32)
    h3 = jnp.maximum(h3 + b3_ref[...], 0.0)

    q = jnp.dot(h3.astype(jnp.bfloat16), w4_ref[...],
                preferred_element_type=jnp.float32)
    # Lane-dense 128-wide store (padded output columns are exact zeros).
    o_ref[...] = (q + b4_ref[...]).astype(o_ref.dtype)


def init_dqn_params(key, input_size, n_actions):
    """PyTorch nn.Linear default init: U(-1/sqrt(fan_in), 1/sqrt(fan_in)).
    Weights stored transposed as (in, out); biases as (1, out)."""
    dims = [(input_size, 128), (128, 256), (256, 128), (128, n_actions)]
    params = {}
    keys = jax.random.split(key, 2 * len(dims))
    for i, (fan_in, fan_out) in enumerate(dims):
        bound = 1.0 / (fan_in ** 0.5)
        w = jax.random.uniform(keys[2 * i], (fan_in, fan_out),
                               minval=-bound, maxval=bound, dtype=jnp.float32)
        b = jax.random.uniform(keys[2 * i + 1], (1, fan_out),
                               minval=-bound, maxval=bound, dtype=jnp.float32)
        params[f"w{i + 1}"] = w
        params[f"b{i + 1}"] = b
    return params


def pack_params(params, n_actions):
    """Prepare kernel-side params: cast weights to bf16 and pad the last layer
    to a lane-dense (128-wide) output slab (zero weight / zero bias)."""
    out_pad = _round_up(max(n_actions, LANE), LANE)
    w4 = params["w4"]
    b4 = params["b4"]
    w4p = jnp.zeros((w4.shape[0], out_pad), jnp.float32).at[:, :n_actions].set(w4)
    b4p = jnp.zeros((1, out_pad), jnp.float32).at[:, :n_actions].set(b4)
    return {
        "w1": params["w1"].astype(jnp.bfloat16), "b1": params["b1"],
        "w2": params["w2"].astype(jnp.bfloat16), "b2": params["b2"],
        "w3": params["w3"].astype(jnp.bfloat16), "b3": params["b3"],
        "w4": w4p.astype(jnp.bfloat16),          "b4": b4p,
        "n_actions": n_actions,
    }


def dqn_forward(x, packed, *, block_b=512):
    """x: [B, input_size] f32; packed: output of pack_params."""
    B, in_dim = x.shape
    n_actions = packed["n_actions"]
    out_pad = packed["w4"].shape[1]

    # Pad batch to a sublane multiple, pick the batch tile, pad to tile.
    b_pad = _round_up(max(B, SUBLANE), SUBLANE)
    tb = min(block_b, b_pad)
    b_pad = _round_up(b_pad, tb)
    if b_pad != B:
        x = jnp.pad(x, ((0, b_pad - B), (0, 0)))

    grid = (b_pad // tb,)

    def resident(shape):
        # Full-block spec; same block every grid step -> stays in VMEM.
        return pl.BlockSpec(shape, lambda i: (0, 0))

    args = (x,
            packed["w1"], packed["b1"],
            packed["w2"], packed["b2"],
            packed["w3"], packed["b3"],
            packed["w4"], packed["b4"])

    in_specs = [pl.BlockSpec((tb, in_dim), lambda i: (i, 0))]
    in_specs += [resident(a.shape) for a in args[1:]]

    out = pl.pallas_call(
        dqn_kernel,
        out_shape=jax.ShapeDtypeStruct((b_pad, out_pad), jnp.float32),
        grid=grid,
        in_specs=in_specs,
        out_specs=pl.BlockSpec((tb, out_pad), lambda i: (i, 0)),
        compiler_params=pltpu.CompilerParams(
            dimension_semantics=("parallel",)),
    )(*args)
    return out[:B, :n_actions]


def dqn_reference_f32(x, params):
    """Pure-f32 JAX reference of the original PyTorch module."""
    h = jnp.maximum(x @ params["w1"] + params["b1"], 0.0)
    h = jnp.maximum(h @ params["w2"] + params["b2"], 0.0)
    h = jnp.maximum(h @ params["w3"] + params["b3"], 0.0)
    return h @ params["w4"] + params["b4"]


def dqn_reference_bf16(x, packed, n_actions):
    """Reference mirroring the kernel's bf16-matmul / f32-accumulate math."""
    def mm(a, w):
        return jnp.dot(a.astype(jnp.bfloat16), w,
                       preferred_element_type=jnp.float32)
    h = jnp.maximum(mm(x, packed["w1"]) + packed["b1"], 0.0)
    h = jnp.maximum(mm(h, packed["w2"]) + packed["b2"], 0.0)
    h = jnp.maximum(mm(h, packed["w3"]) + packed["b3"], 0.0)
    q = mm(h, packed["w4"]) + packed["b4"]
    return q[:, :n_actions]


if __name__ == "__main__":
    key = jax.random.PRNGKey(0)
    k_param, k_x = jax.random.split(key)

    batch = 2
    input_size = 8      # FlappyBird state vector size
    n_actions = 2       # flap / no-flap

    params = init_dqn_params(k_param, input_size, n_actions)
    packed = pack_params(params, n_actions)
    x = jax.random.normal(k_x, (batch, input_size), dtype=jnp.float32)

    q_pallas = dqn_forward(x, packed)
    jax.block_until_ready(q_pallas)

    assert q_pallas.shape == (batch, n_actions)

    # Tight check against a reference that uses the same bf16 matmul math.
    q_bf16 = dqn_reference_bf16(x, packed, n_actions)
    assert jnp.allclose(q_pallas, q_bf16, atol=1e-3, rtol=1e-3), \
        "mismatch vs bf16-matmul reference"

    # Loose check against the original full-f32 module semantics.
    q_f32 = dqn_reference_f32(x, params)
    assert jnp.allclose(q_pallas, q_f32, atol=7.5e-2, rtol=7.5e-2), \
        "mismatch vs f32 reference"

    print("KERNEL_OK")
</pallas_src>

<mosaic_0001>
module attributes {stable_mosaic.version = 11 : i64} {
  func.func @dqn_kernel(%arg0: i32, %arg1: memref<8x8xf32, #tpu.memory_space<vmem>>, %arg2: memref<8x128xbf16, #tpu.memory_space<vmem>>, %arg3: memref<1x128xf32, #tpu.memory_space<vmem>>, %arg4: memref<128x256xbf16, #tpu.memory_space<vmem>>, %arg5: memref<1x256xf32, #tpu.memory_space<vmem>>, %arg6: memref<256x128xbf16, #tpu.memory_space<vmem>>, %arg7: memref<1x128xf32, #tpu.memory_space<vmem>>, %arg8: memref<128x128xbf16, #tpu.memory_space<vmem>>, %arg9: memref<1x128xf32, #tpu.memory_space<vmem>>, %arg10: memref<8x128xf32, #tpu.memory_space<vmem>>) attributes {dimension_semantics = [#tpu.dimension_semantics<parallel>], iteration_bounds = array<i64: 1>, scalar_prefetch = 0 : i64, scratch_operands = 0 : i64, tpu.core_type = #tpu.core_type<tc>, window_params = [{transform_indices = @transform_0, window_bounds = array<i64: 8, 8>}, {pipeline_mode = #tpu.pipeline_mode<synchronous>, transform_indices = @transform_1, window_bounds = array<i64: 8, 128>}, {pipeline_mode = #tpu.pipeline_mode<synchronous>, transform_indices = @transform_2, window_bounds = array<i64: 1, 128>}, {pipeline_mode = #tpu.pipeline_mode<synchronous>, transform_indices = @transform_3, window_bounds = array<i64: 128, 256>}, {pipeline_mode = #tpu.pipeline_mode<synchronous>, transform_indices = @transform_4, window_bounds = array<i64: 1, 256>}, {pipeline_mode = #tpu.pipeline_mode<synchronous>, transform_indices = @transform_5, window_bounds = array<i64: 256, 128>}, {pipeline_mode = #tpu.pipeline_mode<synchronous>, transform_indices = @transform_6, window_bounds = array<i64: 1, 128>}, {pipeline_mode = #tpu.pipeline_mode<synchronous>, transform_indices = @transform_7, window_bounds = array<i64: 128, 128>}, {pipeline_mode = #tpu.pipeline_mode<synchronous>, transform_indices = @transform_8, window_bounds = array<i64: 1, 128>}, {transform_indices = @transform_9, window_bounds = array<i64: 8, 128>}]} {
    %c0 = arith.constant 0 : index
    %c0_0 = arith.constant 0 : index
    %0 = vector.load %arg1[%c0, %c0_0] : memref<8x8xf32, #tpu.memory_space<vmem>>, vector<8x8xf32>
    %1 = arith.truncf %0 : vector<8x8xf32> to vector<8x8xbf16>
    %c0_1 = arith.constant 0 : index
    %c0_2 = arith.constant 0 : index
    %2 = vector.load %arg2[%c0_1, %c0_2] : memref<8x128xbf16, #tpu.memory_space<vmem>>, vector<8x128xbf16>
    %cst = arith.constant dense<0.000000e+00> : vector<8x128xf32>
    %3 = tpu.matmul %1, %2, %cst {dimension_numbers = #tpu.dot_dimension_numbers<[1], [0], [0], [1], [0, 0, 1, 1], [], []>} : vector<8x8xbf16>, vector<8x128xbf16>, vector<8x128xf32> -> vector<8x128xf32>
    %c0_3 = arith.constant 0 : index
    %c0_4 = arith.constant 0 : index
    %4 = vector.load %arg3[%c0_3, %c0_4] : memref<1x128xf32, #tpu.memory_space<vmem>>, vector<1x128xf32>
    %5 = vector.broadcast %4 : vector<1x128xf32> to vector<8x128xf32>
    %6 = arith.addf %3, %5 : vector<8x128xf32>
    %cst_5 = arith.constant 0.000000e+00 : f32
    %7 = vector.broadcast %cst_5 : f32 to vector<8x128xf32>
    %8 = arith.maximumf %6, %7 : vector<8x128xf32>
    %9 = arith.truncf %8 : vector<8x128xf32> to vector<8x128xbf16>
    %c0_6 = arith.constant 0 : index
    %c0_7 = arith.constant 0 : index
    %10 = vector.load %arg4[%c0_6, %c0_7] : memref<128x256xbf16, #tpu.memory_space<vmem>>, vector<128x256xbf16>
    %cst_8 = arith.constant dense<0.000000e+00> : vector<8x256xf32>
    %11 = tpu.matmul %9, %10, %cst_8 {dimension_numbers = #tpu.dot_dimension_numbers<[1], [0], [0], [1], [0, 0, 1, 1], [], []>} : vector<8x128xbf16>, vector<128x256xbf16>, vector<8x256xf32> -> vector<8x256xf32>
    %c0_9 = arith.constant 0 : index
    %c0_10 = arith.constant 0 : index
    %12 = vector.load %arg5[%c0_9, %c0_10] : memref<1x256xf32, #tpu.memory_space<vmem>>, vector<1x256xf32>
    %13 = vector.broadcast %12 : vector<1x256xf32> to vector<8x256xf32>
    %14 = arith.addf %11, %13 : vector<8x256xf32>
    %cst_11 = arith.constant 0.000000e+00 : f32
    %15 = vector.broadcast %cst_11 : f32 to vector<8x256xf32>
    %16 = arith.maximumf %14, %15 : vector<8x256xf32>
    %17 = arith.truncf %16 : vector<8x256xf32> to vector<8x256xbf16>
    %c0_12 = arith.constant 0 : index
    %c0_13 = arith.constant 0 : index
    %18 = vector.load %arg6[%c0_12, %c0_13] : memref<256x128xbf16, #tpu.memory_space<vmem>>, vector<256x128xbf16>
    %cst_14 = arith.constant dense<0.000000e+00> : vector<8x128xf32>
    %19 = tpu.matmul %17, %18, %cst_14 {dimension_numbers = #tpu.dot_dimension_numbers<[1], [0], [0], [1], [0, 0, 1, 1], [], []>} : vector<8x256xbf16>, vector<256x128xbf16>, vector<8x128xf32> -> vector<8x128xf32>
    %c0_15 = arith.constant 0 : index
    %c0_16 = arith.constant 0 : index
    %20 = vector.load %arg7[%c0_15, %c0_16] : memref<1x128xf32, #tpu.memory_space<vmem>>, vector<1x128xf32>
    %21 = vector.broadcast %20 : vector<1x128xf32> to vector<8x128xf32>
    %22 = arith.addf %19, %21 : vector<8x128xf32>
    %cst_17 = arith.constant 0.000000e+00 : f32
    %23 = vector.broadcast %cst_17 : f32 to vector<8x128xf32>
    %24 = arith.maximumf %22, %23 : vector<8x128xf32>
    %25 = arith.truncf %24 : vector<8x128xf32> to vector<8x128xbf16>
    %c0_18 = arith.constant 0 : index
    %c0_19 = arith.constant 0 : index
    %26 = vector.load %arg8[%c0_18, %c0_19] : memref<128x128xbf16, #tpu.memory_space<vmem>>, vector<128x128xbf16>
    %cst_20 = arith.constant dense<0.000000e+00> : vector<8x128xf32>
    %27 = tpu.matmul %25, %26, %cst_20 {dimension_numbers = #tpu.dot_dimension_numbers<[1], [0], [0], [1], [0, 0, 1, 1], [], []>} : vector<8x128xbf16>, vector<128x128xbf16>, vector<8x128xf32> -> vector<8x128xf32>
    %c0_21 = arith.constant 0 : index
    %c0_22 = arith.constant 0 : index
    %28 = vector.load %arg9[%c0_21, %c0_22] : memref<1x128xf32, #tpu.memory_space<vmem>>, vector<1x128xf32>
    %29 = vector.broadcast %28 : vector<1x128xf32> to vector<8x128xf32>
    %30 = arith.addf %27, %29 : vector<8x128xf32>
    %c0_23 = arith.constant 0 : index
    %c0_24 = arith.constant 0 : index
    %31 = vector.load %arg10[%c0_23, %c0_24] : memref<8x128xf32, #tpu.memory_space<vmem>>, vector<8x128xf32>
    tpu.vector_store %arg10[%c0_23, %c0_24], %30 {strides = array<i32>} : memref<8x128xf32, #tpu.memory_space<vmem>>, vector<8x128xf32>,
    return
  }
  func.func @transform_0(%arg0: i32) -> (i32, i32) {
    %c0_i32 = arith.constant 0 : i32
    %c0_i32_0 = arith.constant 0 : i32
    return %arg0, %c0_i32 : i32, i32
  }
  func.func @transform_1(%arg0: i32) -> (i32, i32) {
    %c0_i32 = arith.constant 0 : i32
    %c0_i32_0 = arith.constant 0 : i32
    %c0_i32_1 = arith.constant 0 : i32
    return %c0_i32, %c0_i32_0 : i32, i32
  }
  func.func @transform_2(%arg0: i32) -> (i32, i32) {
    %c0_i32 = arith.constant 0 : i32
    %c0_i32_0 = arith.constant 0 : i32
    %c0_i32_1 = arith.constant 0 : i32
    return %c0_i32, %c0_i32_0 : i32, i32
  }
  func.func @transform_3(%arg0: i32) -> (i32, i32) {
    %c0_i32 = arith.constant 0 : i32
    %c0_i32_0 = arith.constant 0 : i32
    %c0_i32_1 = arith.constant 0 : i32
    return %c0_i32, %c0_i32_0 : i32, i32
  }
  func.func @transform_4(%arg0: i32) -> (i32, i32) {
    %c0_i32 = arith.constant 0 : i32
    %c0_i32_0 = arith.constant 0 : i32
    %c0_i32_1 = arith.constant 0 : i32
    return %c0_i32, %c0_i32_0 : i32, i32
  }
  func.func @transform_5(%arg0: i32) -> (i32, i32) {
    %c0_i32 = arith.constant 0 : i32
    %c0_i32_0 = arith.constant 0 : i32
    %c0_i32_1 = arith.constant 0 : i32
    return %c0_i32, %c0_i32_0 : i32, i32
  }
  func.func @transform_6(%arg0: i32) -> (i32, i32) {
    %c0_i32 = arith.constant 0 : i32
    %c0_i32_0 = arith.constant 0 : i32
    %c0_i32_1 = arith.constant 0 : i32
    return %c0_i32, %c0_i32_0 : i32, i32
  }
  func.func @transform_7(%arg0: i32) -> (i32, i32) {
    %c0_i32 = arith.constant 0 : i32
    %c0_i32_0 = arith.constant 0 : i32
    %c0_i32_1 = arith.constant 0 : i32
    return %c0_i32, %c0_i32_0 : i32, i32
  }
  func.func @transform_8(%arg0: i32) -> (i32, i32) {
    %c0_i32 = arith.constant 0 : i32
    %c0_i32_0 = arith.constant 0 : i32
    %c0_i32_1 = arith.constant 0 : i32
    return %c0_i32, %c0_i32_0 : i32, i32
  }
  func.func @transform_9(%arg0: i32) -> (i32, i32) {
    %c0_i32 = arith.constant 0 : i32
    %c0_i32_0 = arith.constant 0 : i32
    return %arg0, %c0_i32 : i32, i32
  }
}

</mosaic_0001>

<bundles_post_ra>
// kernel: tpu_custom_call.1
= control target key start
LH: loop header
LB: loop body
LE: loop exit
PB: predicated region body
PF: predicated region fallthrough
CT: control target
= control target key end

     0   :  { %14 = vsyncpa [#allocation3], 0  ;;  %s1101_s0 = inlined_call_operand.hbm [shape: f32[8,8], index: 0, kind: input, shape index: {}]   ;;  %s1102_s1 = inlined_call_operand.hbm [shape: bf16[8,128], index: 1, kind: input, shape index: {}]   ;;  %s1103_s2 = inlined_call_operand.vmem [shape: f32[1,128], index: 2, kind: input, shape index: {}]   ;;  %s1104_s3 = inlined_call_operand.hbm [shape: bf16[128,256], index: 3, kind: input, shape index: {}]   ;;  %s1105_s4 = inlined_call_operand.vmem [shape: f32[1,256], index: 4, kind: input, shape index: {}]   ;;  %s1106_s5 = inlined_call_operand.hbm [shape: bf16[256,128], index: 5, kind: input, shape index: {}]   ;;  %s1107_s6 = inlined_call_operand.vmem [shape: f32[1,128], index: 6, kind: input, shape index: {}]   ;;  %s1108_s7 = inlined_call_operand.hbm [shape: bf16[128,128], index: 7, kind: input, shape index: {}]   ;;  %s1109_s8 = inlined_call_operand.vmem [shape: f32[1,128], index: 8, kind: input, shape index: {}]   ;;  %s1110_s9 = inlined_call_operand.hbm [shape: f32[8,128], index: 9, kind: output, shape index: {}]  }
   0x1   :  { %15 = vsyncpa [#allocation6], 0 }
   0x2   :  { %16 = vsyncpa [#allocation9], 0 }
   0x3   :  { %17 = vsyncpa [#allocation4], 0  ;;  %s921_s30 = smov [#allocation5]   ;;  %s922_s11 = smov [#allocation8]  }
   0x4   :  { %s34_s10 = sshll.u32 %s921_s30, 4  ;;  %s59_s12 = sshll.u32 %s922_s11, 4  ;;  %s35_s10 = int_to_ptr.vmem [resolvable:$true] %s34_s10  ;;  %s984_s12 = int_to_ptr.vmem [resolvable:$true] %s59_s12 }
   0x5   :  { %s781_s15 = scalar_lea.hbm %s1102_s1, 64 }
   0x6   :  { %p782_p0 = scmp.ne.s32.totalorder %s1102_s1, %s781_s15  ;;  %p785_p1 = scmp.lt.u32.totalorder %s781_s15, %s1102_s1 }
   0x8   :  { %p787_p2 = pnand %p785_p1, %p782_p0 }
   0xa   :  { %790 = shalt.err (!%p787_p2)
}
   0xb   :  { %s791_s20 = scalar_lea.vmem %s35_s10, 64  ;;  %p796_p4 = scmp.lt.s32.totalorder %s35_s10, %s35_s10 }
   0xc   :  { %p792_p3 = scmp.ne.s32.totalorder %s35_s10, %s791_s20  ;;  %p797_p5 = scmp.lt.s32.totalorder %s791_s20, %s791_s20 }
   0xe   :  { %p798_p6 = por %p797_p5, %p796_p4 }
  0x10   :  { %p799_p7 = pnand %p798_p6, %p792_p3 }
  0x12   :  { %802 = shalt.err (!%p799_p7)
}
  0x13   :  { %37 = dma.hbm_to_vmem [thread:$0]  %s1102_s1, 64, %s35_s10, [#allocation6]  }
  0x14   :  { %s803_s25 = scalar_lea.hbm %s1106_s5, 2048 }
  0x15   :  { %p804_p8 = scmp.ne.s32.totalorder %s1106_s5, %s803_s25  ;;  %p807_p9 = scmp.lt.u32.totalorder %s803_s25, %s1106_s5 }
  0x17   :  { %p809_p10 = pnand %p807_p9, %p804_p8 }
  0x19   :  { %812 = shalt.err (!%p809_p10)
}
  0x1a   :  { %s813_s30 = scalar_lea.vmem %s984_s12, 2048  ;;  %p818_p12 = scmp.lt.s32.totalorder %s984_s12, %s984_s12 }
  0x1b   :  { %p814_p11 = scmp.ne.s32.totalorder %s984_s12, %s813_s30  ;;  %p819_p13 = scmp.lt.s32.totalorder %s813_s30, %s813_s30 }
  0x1d   :  { %p820_p0 = por %p819_p13, %p818_p12 }
  0x1f   :  { %p821_p1 = pnand %p820_p0, %p814_p11 }
  0x21   :  { %824 = shalt.err (!%p821_p1)
}
  0x22   :  { %s923_s1 = smov 64   ;;  %s924_s10 = smov 4  }
  0x23   :  { %65 = dma.hbm_to_vmem [thread:$0]  %s1106_s5, 2048, %s984_s12, [#allocation9], %s923_s1, %s923_s1, %s924_s10  }
  0x24   :  { %s925_s14 = smov [#allocation2]   ;;  %s926_s16 = smov [#allocation7]  }
  0x25   :  { %s24_s15 = sshll.u32 %s925_s14, 4  ;;  %s45_s17 = sshll.u32 %s926_s16, 4  ;;  %s25_s15 = int_to_ptr.vmem [resolvable:$true] %s24_s15  ;;  %s1018_s17 = int_to_ptr.vmem [resolvable:$true] %s45_s17 }
  0x26   :  { %s825_s20 = scalar_lea.hbm %s1101_s0, 128 }
  0x27   :  { %p826_p2 = scmp.ne.s32.totalorder %s1101_s0, %s825_s20  ;;  %p829_p3 = scmp.lt.u32.totalorder %s825_s20, %s1101_s0 }
  0x29   :  { %p831_p4 = pnand %p829_p3, %p826_p2 }
  0x2b   :  { %834 = shalt.err (!%p831_p4)
}
  0x2c   :  { %s835_s5 = scalar_lea.vmem %s25_s15, 128  ;;  %p840_p6 = scmp.lt.s32.totalorder %s25_s15, %s25_s15 }
  0x2d   :  { %p836_p5 = scmp.ne.s32.totalorder %s25_s15, %s835_s5  ;;  %p841_p7 = scmp.lt.s32.totalorder %s835_s5, %s835_s5 }
  0x2f   :  { %p842_p8 = por %p841_p7, %p840_p6 }
  0x31   :  { %p843_p9 = pnand %p842_p8, %p836_p5 }
  0x33   :  { %846 = shalt.err (!%p843_p9)
}
  0x34   :  { %27 = dma.hbm_to_vmem [thread:$0]  %s1101_s0, 128, %s25_s15, [#allocation3]  }
  0x35   :  { %s847_s28 = scalar_lea.hbm %s1104_s3, 2048 }
  0x36   :  { %p848_p10 = scmp.ne.s32.totalorder %s1104_s3, %s847_s28  ;;  %p851_p11 = scmp.lt.u32.totalorder %s847_s28, %s1104_s3 }
  0x38   :  { %p853_p12 = pnand %p851_p11, %p848_p10 }
  0x3a   :  { %856 = shalt.err (!%p853_p12)
}
  0x3b   :  { %s857_s14 = scalar_lea.vmem %s1018_s17, 2048  ;;  %p862_p0 = scmp.lt.s32.totalorder %s1018_s17, %s1018_s17 }
  0x3c   :  { %p858_p13 = scmp.ne.s32.totalorder %s1018_s17, %s857_s14  ;;  %p863_p1 = scmp.lt.s32.totalorder %s857_s14, %s857_s14 }
  0x3e   :  { %p864_p2 = por %p863_p1, %p862_p0 }
  0x40   :  { %p865_p3 = pnand %p864_p2, %p858_p13 }
  0x42   :  { %868 = shalt.err (!%p865_p3)
}
  0x43   :  { %s927_s0 = smov 128   ;;  %s928_s15 = smov 8  }
  0x44   :  { %51 = dma.hbm_to_vmem [thread:$0]  %s1104_s3, 2048, %s1018_s17, [#allocation6], %s927_s0, %s927_s0, %s928_s15  }
  0x45   :  { %s929_s19 = smov [#allocation10]   ;;  %s869_s23 = scalar_lea.hbm %s1108_s7, 1024 }
  0x46   :  { %s73_s20 = sshll.u32 %s929_s19, 4  ;;  %p870_p4 = scmp.ne.s32.totalorder %s1108_s7, %s869_s23  ;;  %s74_s20 = int_to_ptr.vmem [resolvable:$true] %s73_s20 }
  0x47   :  { %p873_p5 = scmp.lt.u32.totalorder %s869_s23, %s1108_s7 }
  0x49   :  { %p875_p6 = pnand %p873_p5, %p870_p4 }
  0x4b   :  { %878 = shalt.err (!%p875_p6)
}
  0x4c   :  { %s879_s26 = scalar_lea.vmem %s74_s20, 1024  ;;  %p884_p8 = scmp.lt.s32.totalorder %s74_s20, %s74_s20 }
  0x4d   :  { %p880_p7 = scmp.ne.s32.totalorder %s74_s20, %s879_s26  ;;  %p885_p9 = scmp.lt.s32.totalorder %s879_s26, %s879_s26 }
  0x4f   :  { %p886_p10 = por %p885_p9, %p884_p8 }
  0x51   :  { %p887_p11 = pnand %p886_p10, %p880_p7 }
  0x53   :  { %890 = shalt.err (!%p887_p11)
}
  0x54   :  { %79 = dma.hbm_to_vmem [thread:$0]  %s1108_s7, 1024, %s74_s20, [#allocation9], %s923_s1, %s923_s1, %s924_s10  }
  0x55   :  { %913 = dma.done.wait [#allocation3], 128  }
  0x56   :  { %914 = vsyncadd [#allocation3], 4294967168 }
  0x57   :  { %915 = dma.done.wait [#allocation6], 2112  }
  0x58   :  { %916 = vsyncadd [#allocation6], 4294965184 }
  0x59   :  { %917 = dma.done.wait [#allocation9], 3072  }
  0x5a   :  { %918 = vsyncadd [#allocation9], 4294964224  ;;  %v930_v0 = vmov 0.0   ;;  %vm931_vm0 = vmmov 0   ;;  %vm112_vm1 = vcmask 1043456   ;;  %v98_v2 = vld [vmem:[#allocation2] sm:$0xff]  ;;  %v176_v52 = vlaneseq }
  0x5b   :  { %694 = vmatprep.subr.bf16.mxu0 %v930_v0  ;;  %696 = vmatprep.mubr.msk.bf16.mxu0 %vm931_vm0, %v930_v0  ;;  %v100_v1 = vld [vmem:[#allocation5] sm:$0xf]  ;;  %v99_v4 = vpack.c.bf16 %v98_v2, %v98_v2  ;;  %v733_v5 = vld [vmem:[#allocation7 + $0x4] ss:$8 sps:$4 sm:$0xff]   ;;  %v735_v6 = vld [vmem:[#allocation7] ss:$8 sps:$4 sm:$0xff]  }
  0x5c   :  { %v114_v3 = vsel %vm112_vm1, %v100_v1, 0  ;;  %vm108_vm2 = vcmask 64512   ;;  %v736_v7 = vld [vmem:[#allocation7 + $0x14] ss:$8 sps:$4 sm:$0xff]   ;;  %266 = vmatprep.subr.bf16.mxu1 %v733_v5  ;;  %v738_v8 = vld [vmem:[#allocation7 + $0x10] ss:$8 sps:$4 sm:$0xff]  }
  0x5d   :  { %695 = vmatpush3.bf16.msra.mxu0 %v114_v3  ;;  %267 = vmatpush1.bf16.msra.mxu1 %v735_v6  ;;  %v739_v9 = vld [vmem:[#allocation7 + $0x24] ss:$8 sps:$4 sm:$0xff]   ;;  %v741_v10 = vld [vmem:[#allocation7 + $0x20] ss:$8 sps:$4 sm:$0xff]   ;;  %v742_v11 = vld [vmem:[#allocation7 + $0x34] ss:$8 sps:$4 sm:$0xff]  }
  0x5e   :  { %268 = vmatprep.subr.bf16.mxu1 %v736_v7  ;;  %v744_v12 = vld [vmem:[#allocation7 + $0x30] ss:$8 sps:$4 sm:$0xff]   ;;  %v745_v13 = vld [vmem:[#allocation7 + $0x44] ss:$8 sps:$4 sm:$0xff]   ;;  %v747_v14 = vld [vmem:[#allocation7 + $0x40] ss:$8 sps:$4 sm:$0xff]  }
  0x5f   :  { %v748_v15 = vld [vmem:[#allocation7 + $0x54] ss:$8 sps:$4 sm:$0xff]   ;;  %v750_v16 = vld [vmem:[#allocation7 + $0x50] ss:$8 sps:$4 sm:$0xff]   ;;  %v751_v17 = vld [vmem:[#allocation7 + $0x64] ss:$8 sps:$4 sm:$0xff]  }
  0x60   :  { %697 = vmatmul.mubr.msk.bf16.vlgmr.msra.gmra.mrb[0].mxu0 %vm108_vm2, %v99_v4  ;;  %v753_v18 = vld [vmem:[#allocation7 + $0x60] ss:$8 sps:$4 sm:$0xff]   ;;  %v754_v19 = vld [vmem:[#allocation7 + $0x74] ss:$8 sps:$4 sm:$0xff]   ;;  %v756_v20 = vld [vmem:[#allocation7 + $0x70] ss:$8 sps:$4 sm:$0xff]  }
  0x61   :  { %269 = vmatpush1.bf16.msra.mxu1 %v738_v8  ;;  %v932_v21 = vmov 0   ;;  %v757_v22 = vld [vmem:[#allocation8 + $0x40] sm:$0xff]   ;;  %v759_v24 = vld [vmem:[#allocation8 + $0x48] sm:$0xff]   ;;  %v761_v26 = vld [vmem:[#allocation8 + $0x50] sm:$0xff]   ;;  %v177_v53 = vshrl.u32 %v176_v52, 7  ;;  %s933_s30 = smov [#allocation11]  }
  0x62   :  { %270 = vmatprep.subr.bf16.mxu1 %v739_v9  ;;  %298 = vmatprep.mubr.bf16.mxu1 %v932_v21  ;;  %v758_v23 = vld [vmem:[#allocation8] sm:$0xff]   ;;  %v760_v25 = vld [vmem:[#allocation8 + $0x8] sm:$0xff]   ;;  %v762_v27 = vld [vmem:[#allocation8 + $0x10] sm:$0xff]   ;;  %s606_s11 = sshll.u32 %s933_s30, 4  ;;  %s607_s11 = int_to_ptr.vmem [resolvable:$true] %s606_s11 }
  0x63   :  { %663 = vmatprep.subr.bf16.mxu0 %v757_v22  ;;  %v763_v28 = vld [vmem:[#allocation8 + $0x58] sm:$0xff]   ;;  %v765_v30 = vld [vmem:[#allocation8 + $0x60] sm:$0xff]   ;;  %v767_v32 = vld [vmem:[#allocation8 + $0x68] sm:$0xff]   ;;  %v178_v54 = vsub.s32 0, %v177_v53  ;;  %v182_v56 = vsub.s32 1, %v177_v53  ;;  %p896_p13 = scmp.lt.s32.totalorder %s607_s11, %s607_s11 }
  0x64   :  { %664 = vmatpush3.bf16.msra.mxu0 %v758_v23  ;;  %v764_v29 = vld [vmem:[#allocation8 + $0x18] sm:$0xff]   ;;  %v766_v31 = vld [vmem:[#allocation8 + $0x20] sm:$0xff]   ;;  %v768_v33 = vld [vmem:[#allocation8 + $0x28] sm:$0xff]  }
  0x65   :  { %271 = vmatpush1.bf16.msra.mxu1 %v741_v10  ;;  %665 = vmatprep.subr.bf16.mxu0 %v759_v24  ;;  %v617_v34 = vld [vmem:[%s1103_s2] ss:$0 sm:$0xff]  ;;  %v771_v44 = vld [vmem:[#allocation8 + $0x78] sm:$0xff]   ;;  %v773_v46 = vld [vmem:[#allocation10] sm:$0xff]  }
  0x66   :  { %272 = vmatprep.subr.bf16.mxu1 %v742_v11  ;;  %v769_v42 = vld [vmem:[#allocation8 + $0x70] sm:$0xff]   ;;  %v772_v45 = vld [vmem:[#allocation8 + $0x38] sm:$0xff]   ;;  %v774_v47 = vld [vmem:[#allocation10 + $0x8] sm:$0xff]  }
  0x67   :  { %v770_v43 = vld [vmem:[#allocation8 + $0x30] sm:$0xff]   ;;  %v776_v49 = vld [vmem:[#allocation10 + $0x18] sm:$0xff]   ;;  %v777_v50 = vld [vmem:[#allocation10 + $0x20] sm:$0xff]  }
  0x68   :  { %666 = vmatpush3.bf16.msra.mxu0 %v760_v25  ;;  %v775_v48 = vld [vmem:[#allocation10 + $0x10] sm:$0xff]   ;;  %v778_v51 = vld [vmem:[#allocation10 + $0x28] sm:$0xff]   ;;  %v780_v7 = vld [vmem:[#allocation10 + $0x38] sm:$0xff]  }
  0x69   :  { %273 = vmatpush1.bf16.msra.mxu1 %v744_v12  ;;  %667 = vmatprep.subr.bf16.mxu0 %v761_v26  ;;  %v174_v55 = vld [vmem:[%s1105_s4] sm:$0x3] }
  0x6a   :  { %274 = vmatprep.subr.bf16.mxu1 %v745_v13  ;;  %v179_v57 = vrot.slane %v174_v55, %v178_v54  ;;  %v183_v58 = vrot.slane %v174_v55, %v182_v56  ;;  %v779_v6 = vld [vmem:[#allocation10 + $0x30] sm:$0xff]  }
  0x6b   :  { %v635_v9 = vld [vmem:[%s1107_s6] ss:$0 sm:$0xff]  ;;  %s891_s6 = scalar_lea.vmem %s607_s11, 128 }
  0x6c   :  { %668 = vmatpush3.bf16.msra.mxu0 %v762_v27  ;;  %p892_p12 = scmp.ne.s32.totalorder %s607_s11, %s891_s6  ;;  %p897_p0 = scmp.lt.s32.totalorder %s891_s6, %s891_s6 }
  0x6d   :  { %275 = vmatpush1.bf16.msra.mxu1 %v747_v14  ;;  %669 = vmatprep.subr.bf16.mxu0 %v763_v28 }
  0x6e   :  { %276 = vmatprep.subr.bf16.mxu1 %v748_v15  ;;  %p898_p1 = por %p897_p0, %p896_p13 }
  0x70   :  { %670 = vmatpush3.bf16.msra.mxu0 %v764_v29  ;;  %p899_p2 = pnand %p898_p1, %p892_p12 }
  0x71   :  { %277 = vmatpush1.bf16.msra.mxu1 %v750_v16  ;;  %671 = vmatprep.subr.bf16.mxu0 %v765_v30 }
  0x72   :  { %278 = vmatprep.subr.bf16.mxu1 %v751_v17  ;;  %v652_v17 = vld [vmem:[%s1109_s8] ss:$0 sm:$0xff] }
  0x74   :  { %672 = vmatpush3.bf16.msra.mxu0 %v766_v31 }
  0x75   :  { %279 = vmatpush1.bf16.msra.mxu1 %v753_v18  ;;  %673 = vmatprep.subr.bf16.mxu0 %v767_v32 }
  0x76   :  { %280 = vmatprep.subr.bf16.mxu1 %v754_v19 }
  0x78   :  { %674 = vmatpush3.bf16.msra.mxu0 %v768_v33 }
  0x79   :  { %281 = vmatpush1.bf16.msra.mxu1 %v756_v20  ;;  %675 = vmatprep.subr.bf16.mxu0 %v769_v42 }
  0x7a   :  { %700 = vmatprep.subr.bf16.mxu1 %v930_v0 }
  0x7c   :  { %676 = vmatpush3.bf16.msra.mxu0 %v770_v43 }
  0x7d   :  { %677 = vmatprep.subr.bf16.mxu0 %v771_v44 }
  0x80   :  { %678 = vmatpush3.bf16.msra.mxu0 %v772_v45 }
 0x133   :  { %v150_v35 = vpop.f32.mrb[0].mxu0 }
 0x134   :  { %v151_v36 = vadd.f32 %v617_v34, %v150_v35  ;;  %v698_v37 = vpop.f32.mrb[1].mxu0 }
 0x135   :  { %v153_v38 = vpop.f32.mrb[2].mxu0 }
 0x136   :  { %v156_v39 = vmax.f32 %v151_v36, 0.0  ;;  %v699_v40 = vpop.f32.mrb[3].mxu0 }
 0x138   :  { %v157_v41 = vpack.c.bf16 %v156_v39, %v156_v39 }
 0x13a   :  { %299 = vmatmul.mubr.bf16.vlgmr.msra.gmra.mrb[0].mxu1 %v157_v41 }
 0x13b   :  { %716 = vmatprep.mubr.msk.bf16.mxu1 %vm931_vm0, %v930_v0  ;;  %701 = vmatpush3.bf16.msra.mxu1 %v773_v46 }
 0x13c   :  { %702 = vmatprep.subr.bf16.mxu1 %v930_v0 }
 0x13f   :  { %703 = vmatpush3.bf16.msra.mxu1 %v774_v47 }
 0x140   :  { %704 = vmatprep.subr.bf16.mxu1 %v930_v0 }
 0x143   :  { %705 = vmatpush3.bf16.msra.mxu1 %v775_v48 }
 0x144   :  { %706 = vmatprep.subr.bf16.mxu1 %v930_v0 }
 0x147   :  { %707 = vmatpush3.bf16.msra.mxu1 %v776_v49 }
 0x148   :  { %708 = vmatprep.subr.bf16.mxu1 %v930_v0 }
 0x14b   :  { %709 = vmatpush3.bf16.msra.mxu1 %v777_v50 }
 0x14c   :  { %710 = vmatprep.subr.bf16.mxu1 %v930_v0 }
 0x14f   :  { %711 = vmatpush3.bf16.msra.mxu1 %v778_v51 }
 0x150   :  { %712 = vmatprep.subr.bf16.mxu1 %v930_v0 }
 0x153   :  { %713 = vmatpush3.bf16.msra.mxu1 %v779_v6 }
 0x154   :  { %714 = vmatprep.subr.bf16.mxu1 %v930_v0 }
 0x157   :  { %715 = vmatpush3.bf16.msra.mxu1 %v780_v7 }
 0x20d   :  { %v300_v59 = vpop.f32.mrb[0].mxu1 }
 0x20e   :  { %v301_v60 = vadd.f32 %v300_v59, %v179_v57  ;;  %v302_v61 = vpop.f32.mrb[1].mxu1 }
 0x20f   :  { %v303_v62 = vadd.f32 %v302_v61, %v183_v58  ;;  %v304_v63 = vpop.f32.mrb[2].mxu1 }
 0x210   :  { %v307_v1 = vmax.f32 %v301_v60, 0.0  ;;  %v305_v2 = vpop.f32.mrb[3].mxu1 }
 0x211   :  { %v308_v3 = vmax.f32 %v303_v62, 0.0 }
 0x212   :  { %v309_v5 = vpack.c.bf16 %v307_v1, %v307_v1 }
 0x213   :  { %v310_v4 = vpack.c.bf16 %v308_v3, %v308_v3 }
 0x215   :  { %478 = vmatprep.mubr.bf16.mxu0 %v310_v4 }
 0x216   :  { %479 = vmatmul.mubr.bf16.vlgmr.msra.gmra.mrb[4].mxu0 %v309_v5 }
 0x2e9   :  { %v679_v8 = vpop.f32.mrb[4].mxu0 }
 0x2ea   :  { %v680_v10 = vpop.f32.mrb[5].mxu0 }
 0x2eb   :  { %v681_v11 = vadd.f32 %v680_v10, %v679_v8  ;;  %v682_v12 = vpop.f32.mrb[6].mxu0 }
 0x2ec   :  { %v683_v13 = vpop.f32.mrb[7].mxu0 }
 0x2ed   :  { %v481_v14 = vadd.f32 %v681_v11, %v635_v9 }
 0x2ef   :  { %v486_v15 = vmax.f32 %v481_v14, 0.0 }
 0x2f1   :  { %v487_v16 = vpack.c.bf16 %v486_v15, %v486_v15 }
 0x2f3   :  { %717 = vmatmul.mubr.bf16.vlgmr.msra.gmra.mrb[4].mxu1 %v487_v16 }
 0x3c6   :  { %v593_v0 = vpop.f32.mrb[4].mxu1 }
 0x3c7   :  { %v594_v18 = vadd.f32 %v652_v17, %v593_v0  ;;  %v718_v19 = vpop.f32.mrb[5].mxu1 }
 0x3c8   :  { %v596_v20 = vpop.f32.mrb[6].mxu1 }
 0x3c9   :  { %599 = vst [vmem:[#allocation11] sm:$0xff] %v594_v18  ;;  %v719_v21 = vpop.f32.mrb[7].mxu1 }
 0x3ca   :  { %902 = shalt.err (!%p899_p2)
}
 0x3cb   :  { %s903_s8 = scalar_lea.hbm %s1110_s9, 128 }
 0x3cc   :  { %p904_p3 = scmp.ne.s32.totalorder %s1110_s9, %s903_s8  ;;  %p907_p4 = scmp.lt.u32.totalorder %s903_s8, %s1110_s9 }
 0x3ce   :  { %p909_p5 = pnand %p907_p4, %p904_p3 }
 0x3d0   :  { %912 = shalt.err (!%p909_p5)
}
 0x3d1   :  { %609 = dma.vmem_to_hbm [thread:$0]  %s607_s11, 128, %s1110_s9, [#allocation4]  }
 0x3d2   :  { %919 = dma.done.wait [#allocation4], 128  }
 0x3d3   :  { %920 = vsyncadd [#allocation4], 4294967168 }
 0x3d4   :  { %613 = vsyncpa [#allocation3], 1 }
 0x3d5   :  { %614 = vsyncpa [#allocation6], 1 }
 0x3d6   :  { %615 = vsyncpa [#allocation9], 1 }
 0x3d7   :  { %616 = vsyncpa [#allocation4], 1 }

</bundles_post_ra>
